<compile_context>
chip_gen: v6e
topology: v6e:2x2x1
jax: 0.10.0
libtpu: 0.0.40
codegen_flags: <defaults>
</compile_context>

<pallas_src>
import functools

import jax
import jax.numpy as jnp
from jax.experimental import pallas as pl
from jax.experimental.pallas import tpu as pltpu

HIDDEN = 32    # compound_config.hidden_dim
OUT_DIM = 1    # compound_config.output_dim
OUT_PAD = 128  # lane-dense output slab width (sliced back to OUT_DIM outside)
BATCH = 8      # demo batch


def _round_up(x, n):
    return ((x + n - 1) // n) * n


def cpi_output_kernel(joint_ref, w1_ref, b1_ref, w2_ref, b2_ref,
                      w3_ref, b3_ref, w4_ref, b4_ref, out_ref):
    # Layer 1: Linear(2H, 512) + ReLU   (Dropout -> identity at inference)
    x = joint_ref[...].astype(jnp.bfloat16)
    h = jnp.dot(x, w1_ref[...], preferred_element_type=jnp.float32) + b1_ref[...]
    h = jnp.maximum(h, 0.0)

    # Layer 2: Linear(512, 512) + ReLU  (Dropout -> identity)
    h = jnp.dot(h.astype(jnp.bfloat16), w2_ref[...],
                preferred_element_type=jnp.float32) + b2_ref[...]
    h = jnp.maximum(h, 0.0)

    # Layer 3: Linear(512, 64) + ReLU
    h = jnp.dot(h.astype(jnp.bfloat16), w3_ref[...],
                preferred_element_type=jnp.float32) + b3_ref[...]
    h = jnp.maximum(h, 0.0)                                    # (tm, 64) f32

    # Layer 4: Linear(64, OUT_DIM=1) as VPU multiply + lane reduction.
    val = jnp.sum(h * w4_ref[...], axis=-1, keepdims=True) + b4_ref[...]  # (tm, 1)

    # Lane-dense store: broadcast across 128 lanes -> unmasked vst.
    out_ref[...] = jnp.broadcast_to(val, out_ref.shape).astype(out_ref.dtype)


@functools.partial(jax.jit, static_argnames=("block_m",))
def cpi_forward(cx, px, params, *, block_m=256):
    # block_m=256 matches the v6e/v7x MXU height; 128 also fine on v5e.
    w1, b1, w2, b2, w3, b3, w4, b4 = params
    m = cx.shape[0]

    # Wrapper-side concat: one (m, 2H) operand, a single K=2H matmul in-kernel.
    joint = jnp.concatenate([cx, px], axis=-1).astype(jnp.float32)
    two_h = joint.shape[1]

    tm = min(block_m, _round_up(m, 8))
    m_pad = _round_up(m, tm)
    if m_pad != m:
        joint = jnp.pad(joint, ((0, m_pad - m), (0, 0)))
    grid = (m_pad // tm,)

    def const_spec(shape):
        # Grid-invariant block: fetched once, VMEM-resident across batch tiles.
        return pl.BlockSpec(shape, lambda i: (0, 0))

    flops = 2 * m_pad * (two_h * 512 + 512 * 512 + 512 * 64 + 64)
    bytes_accessed = (
        sum(int(a.size) * a.dtype.itemsize for a in (w1, b1, w2, b2, w3, b3, w4, b4))
        + int(joint.size) * 4 + m_pad * OUT_PAD * 4
    )

    out = pl.pallas_call(
        cpi_output_kernel,
        out_shape=jax.ShapeDtypeStruct((m_pad, OUT_PAD), jnp.float32),
        grid_spec=pltpu.PrefetchScalarGridSpec(
            num_scalar_prefetch=0,
            grid=grid,
            in_specs=[
                pl.BlockSpec((tm, two_h), lambda i: (i, 0)),   # joint: tiled over batch
                const_spec(w1.shape), const_spec(b1.shape),
                const_spec(w2.shape), const_spec(b2.shape),
                const_spec(w3.shape), const_spec(b3.shape),
                const_spec(w4.shape), const_spec(b4.shape),
            ],
            out_specs=pl.BlockSpec((tm, OUT_PAD), lambda i: (i, 0)),
        ),
        compiler_params=pltpu.CompilerParams(
            dimension_semantics=("parallel",)),   # batch tiles shard across TCs (v7x)
        cost_estimate=pl.CostEstimate(
            flops=flops, transcendentals=0, bytes_accessed=bytes_accessed),
    )(joint, w1, b1, w2, b2, w3, b3, w4, b4)

    return out[:m, :OUT_DIM]


def make_params(key):
    ks = jax.random.split(key, 8)
    s = 0.05
    # MXU-fed weights in bf16 (halves HBM weight traffic); biases and the tiny
    # final projection row stay f32 (VPU path, v5e-safe f32 elementwise math).
    w1 = (s * jax.random.normal(ks[0], (2 * HIDDEN, 512), jnp.float32)).astype(jnp.bfloat16)
    b1 = s * jax.random.normal(ks[1], (1, 512), jnp.float32)
    w2 = (s * jax.random.normal(ks[2], (512, 512), jnp.float32)).astype(jnp.bfloat16)
    b2 = s * jax.random.normal(ks[3], (1, 512), jnp.float32)
    w3 = (s * jax.random.normal(ks[4], (512, 64), jnp.float32)).astype(jnp.bfloat16)
    b3 = s * jax.random.normal(ks[5], (1, 64), jnp.float32)
    w4 = s * jax.random.normal(ks[6], (1, 64), jnp.float32)     # Linear(64,1) as a row vector
    b4 = s * jax.random.normal(ks[7], (1, 1), jnp.float32)
    return (w1, b1, w2, b2, w3, b3, w4, b4)


def reference_forward(cx, px, params):
    w1, b1, w2, b2, w3, b3, w4, b4 = params
    joint = jnp.concatenate([cx, px], axis=-1).astype(jnp.float32)
    h = jnp.maximum(jnp.dot(joint.astype(jnp.bfloat16), w1,
                            preferred_element_type=jnp.float32) + b1, 0.0)
    h = jnp.maximum(jnp.dot(h.astype(jnp.bfloat16), w2,
                            preferred_element_type=jnp.float32) + b2, 0.0)
    h = jnp.maximum(jnp.dot(h.astype(jnp.bfloat16), w3,
                            preferred_element_type=jnp.float32) + b3, 0.0)
    return jnp.sum(h * w4, axis=-1, keepdims=True) + b4


if __name__ == "__main__":
    key = jax.random.PRNGKey(0)
    k_cx, k_px, k_cx2, k_px2, k_params = jax.random.split(key, 5)
    params = make_params(k_params)

    # Small demo batch (single grid step).
    cx = jax.random.normal(k_cx, (BATCH, HIDDEN), jnp.float32)
    px = jax.random.normal(k_px, (BATCH, HIDDEN), jnp.float32)
    out = jax.block_until_ready(cpi_forward(cx, px, params))
    ref = reference_forward(cx, px, params)
    assert out.shape == (BATCH, OUT_DIM)
    assert jnp.allclose(out, ref, atol=2e-3, rtol=2e-2)

    # Multi-tile / padded-batch path (batch=300 -> padded to 512, grid of 2).
    m2 = 300
    cx2 = jax.random.normal(k_cx2, (m2, HIDDEN), jnp.float32)
    px2 = jax.random.normal(k_px2, (m2, HIDDEN), jnp.float32)
    out2 = jax.block_until_ready(cpi_forward(cx2, px2, params))
    ref2 = reference_forward(cx2, px2, params)
    assert out2.shape == (m2, OUT_DIM)
    assert jnp.allclose(out2, ref2, atol=2e-3, rtol=2e-2)

    print("KERNEL_OK")
</pallas_src>

<mosaic_0001>
module attributes {stable_mosaic.version = 11 : i64} {
  func.func @cpi_output_kernel(%arg0: i32, %arg1: memref<8x64xf32, #tpu.memory_space<vmem>>, %arg2: memref<64x512xbf16, #tpu.memory_space<vmem>>, %arg3: memref<1x512xf32, #tpu.memory_space<vmem>>, %arg4: memref<512x512xbf16, #tpu.memory_space<vmem>>, %arg5: memref<1x512xf32, #tpu.memory_space<vmem>>, %arg6: memref<512x64xbf16, #tpu.memory_space<vmem>>, %arg7: memref<1x64xf32, #tpu.memory_space<vmem>>, %arg8: memref<1x64xf32, #tpu.memory_space<vmem>>, %arg9: memref<1x1xf32, #tpu.memory_space<vmem>>, %arg10: memref<8x128xf32, #tpu.memory_space<vmem>>) attributes {dimension_semantics = [#tpu.dimension_semantics<parallel>], iteration_bounds = array<i64: 1>, scalar_prefetch = 0 : i64, scratch_operands = 0 : i64, tpu.core_type = #tpu.core_type<tc>, window_params = [{transform_indices = @transform_0, window_bounds = array<i64: 8, 64>}, {pipeline_mode = #tpu.pipeline_mode<synchronous>, transform_indices = @transform_1, window_bounds = array<i64: 64, 512>}, {pipeline_mode = #tpu.pipeline_mode<synchronous>, transform_indices = @transform_2, window_bounds = array<i64: 1, 512>}, {pipeline_mode = #tpu.pipeline_mode<synchronous>, transform_indices = @transform_3, window_bounds = array<i64: 512, 512>}, {pipeline_mode = #tpu.pipeline_mode<synchronous>, transform_indices = @transform_4, window_bounds = array<i64: 1, 512>}, {pipeline_mode = #tpu.pipeline_mode<synchronous>, transform_indices = @transform_5, window_bounds = array<i64: 512, 64>}, {pipeline_mode = #tpu.pipeline_mode<synchronous>, transform_indices = @transform_6, window_bounds = array<i64: 1, 64>}, {pipeline_mode = #tpu.pipeline_mode<synchronous>, transform_indices = @transform_7, window_bounds = array<i64: 1, 64>}, {pipeline_mode = #tpu.pipeline_mode<synchronous>, transform_indices = @transform_8, window_bounds = array<i64: 1, 1>}, {transform_indices = @transform_9, window_bounds = array<i64: 8, 128>}]} {
    %c0 = arith.constant 0 : index
    %c0_0 = arith.constant 0 : index
    %0 = vector.load %arg1[%c0, %c0_0] : memref<8x64xf32, #tpu.memory_space<vmem>>, vector<8x64xf32>
    %1 = arith.truncf %0 : vector<8x64xf32> to vector<8x64xbf16>
    %c0_1 = arith.constant 0 : index
    %c0_2 = arith.constant 0 : index
    %2 = vector.load %arg2[%c0_1, %c0_2] : memref<64x512xbf16, #tpu.memory_space<vmem>>, vector<64x512xbf16>
    %cst = arith.constant dense<0.000000e+00> : vector<8x512xf32>
    %3 = tpu.matmul %1, %2, %cst {dimension_numbers = #tpu.dot_dimension_numbers<[1], [0], [0], [1], [0, 0, 1, 1], [], []>} : vector<8x64xbf16>, vector<64x512xbf16>, vector<8x512xf32> -> vector<8x512xf32>
    %c0_3 = arith.constant 0 : index
    %c0_4 = arith.constant 0 : index
    %4 = vector.load %arg3[%c0_3, %c0_4] : memref<1x512xf32, #tpu.memory_space<vmem>>, vector<1x512xf32>
    %5 = vector.broadcast %4 : vector<1x512xf32> to vector<8x512xf32>
    %6 = arith.addf %3, %5 : vector<8x512xf32>
    %cst_5 = arith.constant 0.000000e+00 : f32
    %7 = vector.broadcast %cst_5 : f32 to vector<8x512xf32>
    %8 = arith.maximumf %6, %7 : vector<8x512xf32>
    %9 = arith.truncf %8 : vector<8x512xf32> to vector<8x512xbf16>
    %c0_6 = arith.constant 0 : index
    %c0_7 = arith.constant 0 : index
    %10 = vector.load %arg4[%c0_6, %c0_7] : memref<512x512xbf16, #tpu.memory_space<vmem>>, vector<512x512xbf16>
    %cst_8 = arith.constant dense<0.000000e+00> : vector<8x512xf32>
    %11 = tpu.matmul %9, %10, %cst_8 {dimension_numbers = #tpu.dot_dimension_numbers<[1], [0], [0], [1], [0, 0, 1, 1], [], []>} : vector<8x512xbf16>, vector<512x512xbf16>, vector<8x512xf32> -> vector<8x512xf32>
    %c0_9 = arith.constant 0 : index
    %c0_10 = arith.constant 0 : index
    %12 = vector.load %arg5[%c0_9, %c0_10] : memref<1x512xf32, #tpu.memory_space<vmem>>, vector<1x512xf32>
    %13 = vector.broadcast %12 : vector<1x512xf32> to vector<8x512xf32>
    %14 = arith.addf %11, %13 : vector<8x512xf32>
    %cst_11 = arith.constant 0.000000e+00 : f32
    %15 = vector.broadcast %cst_11 : f32 to vector<8x512xf32>
    %16 = arith.maximumf %14, %15 : vector<8x512xf32>
    %17 = arith.truncf %16 : vector<8x512xf32> to vector<8x512xbf16>
    %c0_12 = arith.constant 0 : index
    %c0_13 = arith.constant 0 : index
    %18 = vector.load %arg6[%c0_12, %c0_13] : memref<512x64xbf16, #tpu.memory_space<vmem>>, vector<512x64xbf16>
    %cst_14 = arith.constant dense<0.000000e+00> : vector<8x64xf32>
    %19 = tpu.matmul %17, %18, %cst_14 {dimension_numbers = #tpu.dot_dimension_numbers<[1], [0], [0], [1], [0, 0, 1, 1], [], []>} : vector<8x512xbf16>, vector<512x64xbf16>, vector<8x64xf32> -> vector<8x64xf32>
    %c0_15 = arith.constant 0 : index
    %c0_16 = arith.constant 0 : index
    %20 = vector.load %arg7[%c0_15, %c0_16] : memref<1x64xf32, #tpu.memory_space<vmem>>, vector<1x64xf32>
    %21 = vector.broadcast %20 : vector<1x64xf32> to vector<8x64xf32>
    %22 = arith.addf %19, %21 : vector<8x64xf32>
    %cst_17 = arith.constant 0.000000e+00 : f32
    %23 = vector.broadcast %cst_17 : f32 to vector<8x64xf32>
    %24 = arith.maximumf %22, %23 : vector<8x64xf32>
    %c0_18 = arith.constant 0 : index
    %c0_19 = arith.constant 0 : index
    %25 = vector.load %arg8[%c0_18, %c0_19] : memref<1x64xf32, #tpu.memory_space<vmem>>, vector<1x64xf32>
    %26 = vector.broadcast %25 : vector<1x64xf32> to vector<8x64xf32>
    %27 = arith.mulf %24, %26 : vector<8x64xf32>
    %cst_20 = arith.constant dense<0.000000e+00> : vector<8xf32>
    %28 = vector.multi_reduction <add>, %27, %cst_20 [1] : vector<8x64xf32> to vector<8xf32>
    %29 = vector.shape_cast %28 : vector<8xf32> to vector<8x1xf32>
    %c0_21 = arith.constant 0 : index
    %c0_22 = arith.constant 0 : index
    %30 = vector.load %arg9[%c0_21, %c0_22] : memref<1x1xf32, #tpu.memory_space<vmem>>, vector<1x1xf32>
    %31 = vector.broadcast %30 : vector<1x1xf32> to vector<8x1xf32>
    %32 = arith.addf %29, %31 : vector<8x1xf32>
    %33 = vector.shape_cast %32 : vector<8x1xf32> to vector<8x1xf32>
    %34 = vector.broadcast %33 : vector<8x1xf32> to vector<8x128xf32>
    %c0_23 = arith.constant 0 : index
    %c0_24 = arith.constant 0 : index
    %35 = vector.load %arg10[%c0_23, %c0_24] : memref<8x128xf32, #tpu.memory_space<vmem>>, vector<8x128xf32>
    tpu.vector_store %arg10[%c0_23, %c0_24], %34 {strides = array<i32>} : memref<8x128xf32, #tpu.memory_space<vmem>>, vector<8x128xf32>,
    return
  }
  func.func @transform_0(%arg0: i32) -> (i32, i32) {
    %c0_i32 = arith.constant 0 : i32
    %c0_i32_0 = arith.constant 0 : i32
    return %arg0, %c0_i32 : i32, i32
  }
  func.func @transform_1(%arg0: i32) -> (i32, i32) {
    %c0_i32 = arith.constant 0 : i32
    %c0_i32_0 = arith.constant 0 : i32
    %c0_i32_1 = arith.constant 0 : i32
    return %c0_i32, %c0_i32_0 : i32, i32
  }
  func.func @transform_2(%arg0: i32) -> (i32, i32) {
    %c0_i32 = arith.constant 0 : i32
    %c0_i32_0 = arith.constant 0 : i32
    %c0_i32_1 = arith.constant 0 : i32
    return %c0_i32, %c0_i32_0 : i32, i32
  }
  func.func @transform_3(%arg0: i32) -> (i32, i32) {
    %c0_i32 = arith.constant 0 : i32
    %c0_i32_0 = arith.constant 0 : i32
    %c0_i32_1 = arith.constant 0 : i32
    return %c0_i32, %c0_i32_0 : i32, i32
  }
  func.func @transform_4(%arg0: i32) -> (i32, i32) {
    %c0_i32 = arith.constant 0 : i32
    %c0_i32_0 = arith.constant 0 : i32
    %c0_i32_1 = arith.constant 0 : i32
    return %c0_i32, %c0_i32_0 : i32, i32
  }
  func.func @transform_5(%arg0: i32) -> (i32, i32) {
    %c0_i32 = arith.constant 0 : i32
    %c0_i32_0 = arith.constant 0 : i32
    %c0_i32_1 = arith.constant 0 : i32
    return %c0_i32, %c0_i32_0 : i32, i32
  }
  func.func @transform_6(%arg0: i32) -> (i32, i32) {
    %c0_i32 = arith.constant 0 : i32
    %c0_i32_0 = arith.constant 0 : i32
    %c0_i32_1 = arith.constant 0 : i32
    return %c0_i32, %c0_i32_0 : i32, i32
  }
  func.func @transform_7(%arg0: i32) -> (i32, i32) {
    %c0_i32 = arith.constant 0 : i32
    %c0_i32_0 = arith.constant 0 : i32
    %c0_i32_1 = arith.constant 0 : i32
    return %c0_i32, %c0_i32_0 : i32, i32
  }
  func.func @transform_8(%arg0: i32) -> (i32, i32) {
    %c0_i32 = arith.constant 0 : i32
    %c0_i32_0 = arith.constant 0 : i32
    %c0_i32_1 = arith.constant 0 : i32
    return %c0_i32, %c0_i32_0 : i32, i32
  }
  func.func @transform_9(%arg0: i32) -> (i32, i32) {
    %c0_i32 = arith.constant 0 : i32
    %c0_i32_0 = arith.constant 0 : i32
    return %arg0, %c0_i32 : i32, i32
  }
}

</mosaic_0001>

<bundles_post_ra>
// kernel: cpi_forward.1
= control target key start
LH: loop header
LB: loop body
LE: loop exit
PB: predicated region body
PF: predicated region fallthrough
CT: control target
= control target key end

     0   :  { %s2354_s0 = inlined_call_operand.vmem [shape: f32[8,64], index: 0, kind: input, shape index: {}]   ;;  %s2355_s1 = inlined_call_operand.vmem [shape: bf16[64,512], index: 1, kind: input, shape index: {}]   ;;  %s2356_s2 = inlined_call_operand.vmem [shape: f32[1,512], index: 2, kind: input, shape index: {}]   ;;  %s2357_s3 = inlined_call_operand.hbm [shape: bf16[512,512], index: 3, kind: input, shape index: {}]   ;;  %s2358_s4 = inlined_call_operand.vmem [shape: f32[1,512], index: 4, kind: input, shape index: {}]   ;;  %s2359_s5 = inlined_call_operand.vmem [shape: bf16[512,64], index: 5, kind: input, shape index: {}]   ;;  %s2360_s6 = inlined_call_operand.vmem [shape: f32[1,64], index: 6, kind: input, shape index: {}]   ;;  %s2361_s7 = inlined_call_operand.vmem [shape: f32[1,64], index: 7, kind: input, shape index: {}]   ;;  %s2362_s8 = inlined_call_operand.<no memory space> [shape: f32[1,1], index: 8, kind: input, shape index: {}]   ;;  %s2363_s9 = inlined_call_operand.vmem [shape: f32[8,128], index: 9, kind: output, shape index: {}]  }
   0x1   :  { %v14_v0 = vstv %s2362_s8 }
   0x2   :  { %15 = vst [vmem:[#allocation2] sm:$0x1] %v14_v0 }
   0x3   :  { %16 = vsyncpa [#allocation4], 0  ;;  %s2099_s11 = smov [#allocation3]  }
   0x4   :  { %s28_s12 = sshll.u32 %s2099_s11, 4  ;;  %s29_s12 = int_to_ptr.vmem [resolvable:$true] %s28_s12 }
   0x5   :  { %s2085_s13 = scalar_lea.vmem %s29_s12, 16384  ;;  %p2090_p1 = scmp.lt.s32.totalorder %s29_s12, %s29_s12 }
   0x6   :  { %p2086_p0 = scmp.ne.s32.totalorder %s29_s12, %s2085_s13  ;;  %p2091_p2 = scmp.lt.s32.totalorder %s2085_s13, %s2085_s13 }
   0x8   :  { %p2092_p3 = por %p2091_p2, %p2090_p1 }
   0xa   :  { %p2093_p4 = pnand %p2092_p3, %p2086_p0 }
   0xc   :  { %2096 = shalt.err (!%p2093_p4)
}
   0xd   :  { %s2100_s14 = smov 256   ;;  %s2101_s15 = smov 16  }
   0xe   :  { %34 = dma.hbm_to_vmem [thread:$0]  %s2357_s3, 16384, %s29_s12, [#allocation4], %s2100_s14, %s2100_s14, %s2101_s15  }
   0xf   :  { %2097 = dma.done.wait [#allocation4], 16384  }
  0x10   :  { %2098 = vsyncadd [#allocation4], 4294950912  ;;  %v2102_v1 = vmov 0   ;;  %v1829_v2 = vld [vmem:[%s2355_s1 + $0x64] ss:$16 sps:$4 sm:$0xff]   ;;  %vm169_vm0 = vcmask 523264  }
  0x11   :  { %205 = vmatprep.mubr.bf16.mxu0 %v2102_v1  ;;  %246 = vmatprep.mubr.bf16.mxu1 %v2102_v1  ;;  %v1831_v3 = vld [vmem:[%s2355_s1 + $0x6c] ss:$16 sps:$4 sm:$0xff]   ;;  %v1833_v4 = vld [vmem:[%s2355_s1 + $0x60] ss:$16 sps:$4 sm:$0xff]   ;;  %v1834_v5 = vld [vmem:[%s2355_s1 + $0x68] ss:$16 sps:$4 sm:$0xff]  }
  0x12   :  { %1828 = vset.pattern.permute.xlu0 %v2102_v1  ;;  %181 = vmatprep.subr.bf16.mxu0 %v1829_v2  ;;  %v1835_v6 = vld [vmem:[%s2355_s1 + $0x44] ss:$16 sps:$4 sm:$0xff]   ;;  %v1837_v7 = vld [vmem:[%s2355_s1 + $0x4c] ss:$16 sps:$4 sm:$0xff]   ;;  %v1839_v8 = vld [vmem:[%s2355_s1 + $0x40] ss:$16 sps:$4 sm:$0xff]  }
  0x13   :  { %222 = vmatprep.subr.bf16.mxu1 %v1831_v3  ;;  %182 = vmatpush1.bf16.msra.mxu0 %v1833_v4  ;;  %v1840_v9 = vld [vmem:[%s2355_s1 + $0x48] ss:$16 sps:$4 sm:$0xff]   ;;  %v1841_v10 = vld [vmem:[%s2355_s1 + $0x24] ss:$16 sps:$4 sm:$0xff]   ;;  %v1843_v11 = vld [vmem:[%s2355_s1 + $0x2c] ss:$16 sps:$4 sm:$0xff]  }
  0x14   :  { %223 = vmatpush1.bf16.msra.mxu1 %v1834_v5  ;;  %183 = vmatprep.subr.bf16.mxu0 %v1835_v6  ;;  %v1845_v12 = vld [vmem:[%s2355_s1 + $0x20] ss:$16 sps:$4 sm:$0xff]   ;;  %v1846_v13 = vld [vmem:[%s2355_s1 + $0x28] ss:$16 sps:$4 sm:$0xff]   ;;  %v1847_v14 = vld [vmem:[%s2355_s1 + $0x4] ss:$16 sps:$4 sm:$0xff]  }
  0x15   :  { %224 = vmatprep.subr.bf16.mxu1 %v1837_v7  ;;  %v1849_v15 = vld [vmem:[%s2355_s1 + $0xc] ss:$16 sps:$4 sm:$0xff]   ;;  %v1851_v16 = vld [vmem:[%s2355_s1] ss:$16 sps:$4 sm:$0xff]   ;;  %v1852_v17 = vld [vmem:[%s2355_s1 + $0x8] ss:$16 sps:$4 sm:$0xff]  }
  0x16   :  { %v49_v18 = vld [vmem:[%s2354_s0] sm:$0xff] }
  0x17   :  { %184 = vmatpush1.bf16.msra.mxu0 %v1839_v8  ;;  %v1855_v19 = vld [vmem:[#allocation3 + $0xe4] ss:$16 sps:$4 sm:$0xff]   ;;  %v50_v21 = vpack.c.bf16 %v49_v18, %v49_v18  ;;  %v1853_v22 = vld [vmem:[#allocation3 + $0xe0] ss:$16 sps:$4 sm:$0xff]  }
  0x18   :  { %225 = vmatpush1.bf16.msra.mxu1 %v1840_v9  ;;  %185 = vmatprep.subr.bf16.mxu0 %v1841_v10  ;;  %v1858_v20 = vld [vmem:[#allocation3 + $0x2e4] ss:$16 sps:$4 sm:$0xff]   ;;  %v1856_v23 = vld [vmem:[#allocation3 + $0x2e0] ss:$16 sps:$4 sm:$0xff]  }
  0x19   :  { %226 = vmatprep.subr.bf16.mxu1 %v1843_v11  ;;  %v1861_v24 = vld [vmem:[#allocation3 + $0xc4] ss:$16 sps:$4 sm:$0xff]   ;;  %v1859_v26 = vld [vmem:[#allocation3 + $0xc0] ss:$16 sps:$4 sm:$0xff]  }
  0x1a   :  { %v1864_v25 = vld [vmem:[#allocation3 + $0x2c4] ss:$16 sps:$4 sm:$0xff]   ;;  %v1862_v27 = vld [vmem:[#allocation3 + $0x2c0] ss:$16 sps:$4 sm:$0xff]  }
  0x1b   :  { %186 = vmatpush1.bf16.msra.mxu0 %v1845_v12  ;;  %v1867_v28 = vld [vmem:[#allocation3 + $0xa4] ss:$16 sps:$4 sm:$0xff]   ;;  %v1865_v30 = vld [vmem:[#allocation3 + $0xa0] ss:$16 sps:$4 sm:$0xff]  }
  0x1c   :  { %227 = vmatpush1.bf16.msra.mxu1 %v1846_v13  ;;  %187 = vmatprep.subr.bf16.mxu0 %v1847_v14  ;;  %v1870_v29 = vld [vmem:[#allocation3 + $0x2a4] ss:$16 sps:$4 sm:$0xff]   ;;  %v1868_v31 = vld [vmem:[#allocation3 + $0x2a0] ss:$16 sps:$4 sm:$0xff]  }
  0x1d   :  { %228 = vmatprep.subr.bf16.mxu1 %v1849_v15  ;;  %v1873_v32 = vld [vmem:[#allocation3 + $0x84] ss:$16 sps:$4 sm:$0xff]   ;;  %v1871_v34 = vld [vmem:[#allocation3 + $0x80] ss:$16 sps:$4 sm:$0xff]  }
  0x1e   :  { %v1876_v33 = vld [vmem:[#allocation3 + $0x284] ss:$16 sps:$4 sm:$0xff]   ;;  %v1874_v35 = vld [vmem:[#allocation3 + $0x280] ss:$16 sps:$4 sm:$0xff]  }
  0x1f   :  { %188 = vmatpush1.bf16.msra.mxu0 %v1851_v16  ;;  %v1879_v36 = vld [vmem:[#allocation3 + $0x64] ss:$16 sps:$4 sm:$0xff]   ;;  %v1877_v38 = vld [vmem:[#allocation3 + $0x60] ss:$16 sps:$4 sm:$0xff]  }
  0x20   :  { %229 = vmatpush1.bf16.msra.mxu1 %v1852_v17  ;;  %1053 = vmatprep.subr.bf16.mxu0 %v1855_v19  ;;  %v1882_v37 = vld [vmem:[#allocation3 + $0x264] ss:$16 sps:$4 sm:$0xff]   ;;  %v1880_v39 = vld [vmem:[#allocation3 + $0x260] ss:$16 sps:$4 sm:$0xff]  }
  0x21   :  { %1094 = vmatprep.subr.bf16.mxu1 %v1858_v20  ;;  %v1885_v40 = vld [vmem:[#allocation3 + $0x44] ss:$16 sps:$4 sm:$0xff]   ;;  %v1883_v42 = vld [vmem:[#allocation3 + $0x40] ss:$16 sps:$4 sm:$0xff]   ;;  %v1951_v20 = vld [vmem:[#allocation3 + $0xec] ss:$16 sps:$4 sm:$0xff]  }
  0x22   :  { %1615 = vmatmul.mubr.msk.bf16.vlgmr.msra.gmra.mxu0 %vm169_vm0, %v50_v21  ;;  %v1888_v41 = vld [vmem:[#allocation3 + $0x244] ss:$16 sps:$4 sm:$0xff]   ;;  %v1886_v43 = vld [vmem:[#allocation3 + $0x240] ss:$16 sps:$4 sm:$0xff]  }
  0x23   :  { %1616 = vmatmul.mubr.msk.bf16.vlgmr.msra.gmra.mxu1 %vm169_vm0, %v50_v21  ;;  %1054 = vmatpush1.bf16.msra.mxu0 %v1853_v22  ;;  %v1891_v44 = vld [vmem:[#allocation3 + $0x24] ss:$16 sps:$4 sm:$0xff]   ;;  %v1889_v46 = vld [vmem:[#allocation3 + $0x20] ss:$16 sps:$4 sm:$0xff]   ;;  %v1954_v21 = vld [vmem:[#allocation3 + $0x2ec] ss:$16 sps:$4 sm:$0xff]   ;;  %v69_v22 = vlaneseq }
  0x24   :  { %1095 = vmatpush1.bf16.msra.mxu1 %v1856_v23  ;;  %1055 = vmatprep.subr.bf16.mxu0 %v1861_v24  ;;  %v1894_v45 = vld [vmem:[#allocation3 + $0x224] ss:$16 sps:$4 sm:$0xff]   ;;  %v1892_v47 = vld [vmem:[#allocation3 + $0x220] ss:$16 sps:$4 sm:$0xff]  }
  0x25   :  { %1096 = vmatprep.subr.bf16.mxu1 %v1864_v25  ;;  %v1897_v48 = vld [vmem:[#allocation3 + $0x4] ss:$16 sps:$4 sm:$0xff]   ;;  %v1895_v50 = vld [vmem:[#allocation3] ss:$16 sps:$4 sm:$0xff]   ;;  %v2212_v23 = vshrl.u32 %v69_v22, 7 }
  0x26   :  { %v1900_v49 = vld [vmem:[#allocation3 + $0x204] ss:$16 sps:$4 sm:$0xff]   ;;  %v1898_v51 = vld [vmem:[#allocation3 + $0x200] ss:$16 sps:$4 sm:$0xff]   ;;  %v2000_v22 = vld [vmem:[#allocation3 + $0x3e8] ss:$16 sps:$4 sm:$0xff]  }
  0x27   :  { %1056 = vmatpush1.bf16.msra.mxu0 %v1859_v26  ;;  %v1903_v52 = vld [vmem:[#allocation3 + $0x1e4] ss:$16 sps:$4 sm:$0xff]   ;;  %v1901_v54 = vld [vmem:[#allocation3 + $0x1e0] ss:$16 sps:$4 sm:$0xff]   ;;  %v71_v24 = vsub.s32 0, %v2212_v23  ;;  %v79_v25 = vsub.s32 2, %v2212_v23 }
  0x28   :  { %1097 = vmatpush1.bf16.msra.mxu1 %v1862_v27  ;;  %1057 = vmatprep.subr.bf16.mxu0 %v1867_v28  ;;  %v1906_v53 = vld [vmem:[#allocation3 + $0x3e4] ss:$16 sps:$4 sm:$0xff]   ;;  %v1904_v55 = vld [vmem:[#allocation3 + $0x3e0] ss:$16 sps:$4 sm:$0xff]   ;;  %v75_v27 = vsub.s32 1, %v2212_v23  ;;  %v83_v28 = vsub.s32 3, %v2212_v23 }
  0x29   :  { %1098 = vmatprep.subr.bf16.mxu1 %v1870_v29  ;;  %v1909_v56 = vld [vmem:[#allocation3 + $0x1c4] ss:$16 sps:$4 sm:$0xff]   ;;  %v1907_v58 = vld [vmem:[#allocation3 + $0x1c0] ss:$16 sps:$4 sm:$0xff]  }
  0x2a   :  { %v1912_v57 = vld [vmem:[#allocation3 + $0x3c4] ss:$16 sps:$4 sm:$0xff]   ;;  %v1910_v59 = vld [vmem:[#allocation3 + $0x3c0] ss:$16 sps:$4 sm:$0xff]  }
  0x2b   :  { %1058 = vmatpush1.bf16.msra.mxu0 %v1865_v30  ;;  %v1915_v60 = vld [vmem:[#allocation3 + $0x1a4] ss:$16 sps:$4 sm:$0xff]   ;;  %v1913_v62 = vld [vmem:[#allocation3 + $0x1a0] ss:$16 sps:$4 sm:$0xff]  }
  0x2c   :  { %1099 = vmatpush1.bf16.msra.mxu1 %v1868_v31  ;;  %1059 = vmatprep.subr.bf16.mxu0 %v1873_v32  ;;  %v1918_v61 = vld [vmem:[#allocation3 + $0x3a4] ss:$16 sps:$4 sm:$0xff]   ;;  %v1916_v63 = vld [vmem:[#allocation3 + $0x3a0] ss:$16 sps:$4 sm:$0xff]  }
  0x2d   :  { %1100 = vmatprep.subr.bf16.mxu1 %v1876_v33  ;;  %v1921_v0 = vld [vmem:[#allocation3 + $0x184] ss:$16 sps:$4 sm:$0xff]   ;;  %v1919_v2 = vld [vmem:[#allocation3 + $0x180] ss:$16 sps:$4 sm:$0xff]  }
  0x2e   :  { %v1924_v1 = vld [vmem:[#allocation3 + $0x384] ss:$16 sps:$4 sm:$0xff]   ;;  %v1922_v3 = vld [vmem:[#allocation3 + $0x380] ss:$16 sps:$4 sm:$0xff]  }
  0x2f   :  { %1060 = vmatpush1.bf16.msra.mxu0 %v1871_v34  ;;  %v1927_v4 = vld [vmem:[#allocation3 + $0x164] ss:$16 sps:$4 sm:$0xff]   ;;  %v1925_v6 = vld [vmem:[#allocation3 + $0x160] ss:$16 sps:$4 sm:$0xff]  }
  0x30   :  { %1101 = vmatpush1.bf16.msra.mxu1 %v1874_v35  ;;  %1061 = vmatprep.subr.bf16.mxu0 %v1879_v36  ;;  %v1930_v5 = vld [vmem:[#allocation3 + $0x364] ss:$16 sps:$4 sm:$0xff]   ;;  %v1928_v7 = vld [vmem:[#allocation3 + $0x360] ss:$16 sps:$4 sm:$0xff]  }
  0x31   :  { %1102 = vmatprep.subr.bf16.mxu1 %v1882_v37  ;;  %v1933_v8 = vld [vmem:[#allocation3 + $0x144] ss:$16 sps:$4 sm:$0xff]   ;;  %v1931_v10 = vld [vmem:[#allocation3 + $0x140] ss:$16 sps:$4 sm:$0xff]  }
  0x32   :  { %v1936_v9 = vld [vmem:[#allocation3 + $0x344] ss:$16 sps:$4 sm:$0xff]   ;;  %v1934_v11 = vld [vmem:[#allocation3 + $0x340] ss:$16 sps:$4 sm:$0xff]  }
  0x33   :  { %1062 = vmatpush1.bf16.msra.mxu0 %v1877_v38  ;;  %v1939_v12 = vld [vmem:[#allocation3 + $0x124] ss:$16 sps:$4 sm:$0xff]   ;;  %v1937_v14 = vld [vmem:[#allocation3 + $0x120] ss:$16 sps:$4 sm:$0xff]  }
  0x34   :  { %1103 = vmatpush1.bf16.msra.mxu1 %v1880_v39  ;;  %1063 = vmatprep.subr.bf16.mxu0 %v1885_v40  ;;  %v1942_v13 = vld [vmem:[#allocation3 + $0x324] ss:$16 sps:$4 sm:$0xff]   ;;  %v1940_v15 = vld [vmem:[#allocation3 + $0x320] ss:$16 sps:$4 sm:$0xff]  }
  0x35   :  { %1104 = vmatprep.subr.bf16.mxu1 %v1888_v41  ;;  %v1945_v16 = vld [vmem:[#allocation3 + $0x104] ss:$16 sps:$4 sm:$0xff]   ;;  %v1943_v18 = vld [vmem:[#allocation3 + $0x100] ss:$16 sps:$4 sm:$0xff]  }
  0x36   :  { %v1948_v17 = vld [vmem:[#allocation3 + $0x304] ss:$16 sps:$4 sm:$0xff]   ;;  %v1946_v19 = vld [vmem:[#allocation3 + $0x300] ss:$16 sps:$4 sm:$0xff]  }
  0x37   :  { %1064 = vmatpush1.bf16.msra.mxu0 %v1883_v42  ;;  %v67_v26 = vld [vmem:[%s2356_s2] sm:$0xf] }
  0x38   :  { %1105 = vmatpush1.bf16.msra.mxu1 %v1886_v43  ;;  %1065 = vmatprep.subr.bf16.mxu0 %v1891_v44  ;;  %v72_v29 = vrot.slane %v67_v26, %v71_v24  ;;  %v80_v30 = vrot.slane %v67_v26, %v79_v25  ;;  %v76_v31 = vrot.slane %v67_v26, %v75_v27 }
  0x39   :  { %1106 = vmatprep.subr.bf16.mxu1 %v1894_v45  ;;  %v84_v32 = vrot.slane %v67_v26, %v83_v28  ;;  %v2005_v26 = vld [vmem:[#allocation3 + $0x1cc] ss:$16 sps:$4 sm:$0xff]  }
  0x3b   :  { %1066 = vmatpush1.bf16.msra.mxu0 %v1889_v46 }
  0x3c   :  { %1107 = vmatpush1.bf16.msra.mxu1 %v1892_v47  ;;  %1067 = vmatprep.subr.bf16.mxu0 %v1897_v48 }
  0x3d   :  { %1108 = vmatprep.subr.bf16.mxu1 %v1900_v49 }
  0x3f   :  { %1068 = vmatpush1.bf16.msra.mxu0 %v1895_v50 }
  0x40   :  { %1109 = vmatpush1.bf16.msra.mxu1 %v1898_v51  ;;  %1069 = vmatprep.subr.bf16.mxu0 %v1903_v52  ;;  %v1949_v52 = vld [vmem:[#allocation3 + $0xe8] ss:$16 sps:$4 sm:$0xff]  }
  0x41   :  { %1110 = vmatprep.subr.bf16.mxu1 %v1906_v53  ;;  %v1952_v53 = vld [vmem:[#allocation3 + $0x2e8] ss:$16 sps:$4 sm:$0xff]  }
  0x43   :  { %1070 = vmatpush2.bf16.msra.mxu0 %v1901_v54 }
  0x44   :  { %1111 = vmatpush2.bf16.msra.mxu1 %v1904_v55  ;;  %1071 = vmatprep.subr.bf16.mxu0 %v1909_v56  ;;  %v1957_v55 = vld [vmem:[#allocation3 + $0xcc] ss:$16 sps:$4 sm:$0xff]  }
  0x45   :  { %1112 = vmatprep.subr.bf16.mxu1 %v1912_v57  ;;  %v1960_v56 = vld [vmem:[#allocation3 + $0x2cc] ss:$16 sps:$4 sm:$0xff]   ;;  %v1955_v57 = vld [vmem:[#allocation3 + $0xc8] ss:$16 sps:$4 sm:$0xff]  }
  0x47   :  { %1072 = vmatpush2.bf16.msra.mxu0 %v1907_v58  ;;  %v1958_v58 = vld [vmem:[#allocation3 + $0x2c8] ss:$16 sps:$4 sm:$0xff]  }
  0x48   :  { %1113 = vmatpush2.bf16.msra.mxu1 %v1910_v59  ;;  %1073 = vmatprep.subr.bf16.mxu0 %v1915_v60  ;;  %v1963_v59 = vld [vmem:[#allocation3 + $0xac] ss:$16 sps:$4 sm:$0xff]  }
  0x49   :  { %1114 = vmatprep.subr.bf16.mxu1 %v1918_v61  ;;  %v1966_v60 = vld [vmem:[#allocation3 + $0x2ac] ss:$16 sps:$4 sm:$0xff]   ;;  %v1961_v61 = vld [vmem:[#allocation3 + $0xa8] ss:$16 sps:$4 sm:$0xff]  }
  0x4b   :  { %1074 = vmatpush2.bf16.msra.mxu0 %v1913_v62  ;;  %v1964_v62 = vld [vmem:[#allocation3 + $0x2a8] ss:$16 sps:$4 sm:$0xff]  }
  0x4c   :  { %1115 = vmatpush2.bf16.msra.mxu1 %v1916_v63  ;;  %1075 = vmatprep.subr.bf16.mxu0 %v1921_v0  ;;  %v1969_v63 = vld [vmem:[#allocation3 + $0x8c] ss:$16 sps:$4 sm:$0xff]  }
  0x4d   :  { %1116 = vmatprep.subr.bf16.mxu1 %v1924_v1  ;;  %v1972_v0 = vld [vmem:[#allocation3 + $0x28c] ss:$16 sps:$4 sm:$0xff]   ;;  %v1967_v1 = vld [vmem:[#allocation3 + $0x88] ss:$16 sps:$4 sm:$0xff]  }
  0x4f   :  { %1076 = vmatpush2.bf16.msra.mxu0 %v1919_v2  ;;  %v1970_v2 = vld [vmem:[#allocation3 + $0x288] ss:$16 sps:$4 sm:$0xff]  }
  0x50   :  { %1117 = vmatpush2.bf16.msra.mxu1 %v1922_v3  ;;  %1077 = vmatprep.subr.bf16.mxu0 %v1927_v4  ;;  %v1975_v3 = vld [vmem:[#allocation3 + $0x6c] ss:$16 sps:$4 sm:$0xff]  }
  0x51   :  { %1118 = vmatprep.subr.bf16.mxu1 %v1930_v5  ;;  %v1978_v4 = vld [vmem:[#allocation3 + $0x26c] ss:$16 sps:$4 sm:$0xff]   ;;  %v1973_v5 = vld [vmem:[#allocation3 + $0x68] ss:$16 sps:$4 sm:$0xff]  }
  0x53   :  { %1078 = vmatpush2.bf16.msra.mxu0 %v1925_v6  ;;  %v1976_v6 = vld [vmem:[#allocation3 + $0x268] ss:$16 sps:$4 sm:$0xff]  }
  0x54   :  { %1119 = vmatpush2.bf16.msra.mxu1 %v1928_v7  ;;  %1079 = vmatprep.subr.bf16.mxu0 %v1933_v8  ;;  %v1981_v7 = vld [vmem:[#allocation3 + $0x4c] ss:$16 sps:$4 sm:$0xff]  }
  0x55   :  { %1120 = vmatprep.subr.bf16.mxu1 %v1936_v9  ;;  %v1984_v8 = vld [vmem:[#allocation3 + $0x24c] ss:$16 sps:$4 sm:$0xff]   ;;  %v1979_v9 = vld [vmem:[#allocation3 + $0x48] ss:$16 sps:$4 sm:$0xff]  }
  0x57   :  { %1080 = vmatpush2.bf16.msra.mxu0 %v1931_v10  ;;  %v1982_v10 = vld [vmem:[#allocation3 + $0x248] ss:$16 sps:$4 sm:$0xff]  }
  0x58   :  { %1121 = vmatpush2.bf16.msra.mxu1 %v1934_v11  ;;  %1081 = vmatprep.subr.bf16.mxu0 %v1939_v12  ;;  %v1987_v11 = vld [vmem:[#allocation3 + $0x2c] ss:$16 sps:$4 sm:$0xff]  }
  0x59   :  { %1122 = vmatprep.subr.bf16.mxu1 %v1942_v13  ;;  %v1990_v12 = vld [vmem:[#allocation3 + $0x22c] ss:$16 sps:$4 sm:$0xff]   ;;  %v1985_v13 = vld [vmem:[#allocation3 + $0x28] ss:$16 sps:$4 sm:$0xff]  }
  0x5b   :  { %1082 = vmatpush2.bf16.msra.mxu0 %v1937_v14  ;;  %v1988_v14 = vld [vmem:[#allocation3 + $0x228] ss:$16 sps:$4 sm:$0xff]  }
  0x5c   :  { %1123 = vmatpush2.bf16.msra.mxu1 %v1940_v15  ;;  %1083 = vmatprep.subr.bf16.mxu0 %v1945_v16  ;;  %v1993_v15 = vld [vmem:[#allocation3 + $0xc] ss:$16 sps:$4 sm:$0xff]  }
  0x5d   :  { %1124 = vmatprep.subr.bf16.mxu1 %v1948_v17  ;;  %v1996_v16 = vld [vmem:[#allocation3 + $0x20c] ss:$16 sps:$4 sm:$0xff]   ;;  %v1991_v17 = vld [vmem:[#allocation3 + $0x8] ss:$16 sps:$4 sm:$0xff]  }
  0x5f   :  { %1084 = vmatpush2.bf16.msra.mxu0 %v1943_v18  ;;  %v1994_v18 = vld [vmem:[#allocation3 + $0x208] ss:$16 sps:$4 sm:$0xff]  }
  0x60   :  { %1125 = vmatpush2.bf16.msra.mxu1 %v1946_v19  ;;  %1135 = vmatprep.subr.bf16.mxu0 %v1951_v20  ;;  %v1999_v19 = vld [vmem:[#allocation3 + $0x1ec] ss:$16 sps:$4 sm:$0xff]  }
  0x61   :  { %1176 = vmatprep.subr.bf16.mxu1 %v1954_v21  ;;  %v2002_v20 = vld [vmem:[#allocation3 + $0x3ec] ss:$16 sps:$4 sm:$0xff]   ;;  %v1997_v21 = vld [vmem:[#allocation3 + $0x1e8] ss:$16 sps:$4 sm:$0xff]  }
  0xe2   :  { %v207_v33 = vpop.f32.mrf.mxu0 }
  0xe3   :  { %v248_v34 = vpop.f32.mrf.mxu1  ;;  %v208_v35 = vadd.f32 %v207_v33, %v72_v29  ;;  %v2008_v29 = vld [vmem:[#allocation3 + $0x3cc] ss:$16 sps:$4 sm:$0xff]  }
  0xe4   :  { %v249_v36 = vadd.f32 %v248_v34, %v80_v30  ;;  %v209_v37 = vpop.f32.mrf.mxu0  ;;  %v2003_v30 = vld [vmem:[#allocation3 + $0x1c8] ss:$16 sps:$4 sm:$0xff]   ;;  %v2014_v33 = vld [vmem:[#allocation3 + $0x3ac] ss:$16 sps:$4 sm:$0xff]  }
  0xe5   :  { %v250_v38 = vpop.f32.mrf.mxu1  ;;  %v210_v40 = vadd.f32 %v209_v37, %v76_v31  ;;  %v255_v42 = vmax.f32 %v208_v35, 0.0  ;;  %v2006_v31 = vld [vmem:[#allocation3 + $0x3c8] ss:$16 sps:$4 sm:$0xff]   ;;  %v2020_v37 = vld [vmem:[#allocation3 + $0x38c] ss:$16 sps:$4 sm:$0xff]  }
  0xe6   :  { %v257_v39 = vmax.f32 %v249_v36, 0.0  ;;  %v251_v41 = vadd.f32 %v250_v38, %v84_v32  ;;  %v211_v43 = vpop.f32.mrf.mxu0  ;;  %v2011_v32 = vld [vmem:[#allocation3 + $0x1ac] ss:$16 sps:$4 sm:$0xff]   ;;  %v2009_v34 = vld [vmem:[#allocation3 + $0x1a8] ss:$16 sps:$4 sm:$0xff]  }
  0xe7   :  { %v252_v44 = vpop.f32.mrf.mxu1  ;;  %v256_v45 = vmax.f32 %v210_v40, 0.0  ;;  %v2231_v54 = vpack.c.bf16 %v255_v42, %v255_v42  ;;  %v2012_v35 = vld [vmem:[#allocation3 + $0x3a8] ss:$16 sps:$4 sm:$0xff]   ;;  %v2017_v36 = vld [vmem:[#allocation3 + $0x18c] ss:$16 sps:$4 sm:$0xff]  }
  0xe8   :  { %v258_v46 = vmax.f32 %v251_v41, 0.0  ;;  %v2229_v47 = vpack.c.bf16 %v257_v39, %v257_v39  ;;  %v212_v48 = vpop.f32.mrf.mxu0  ;;  %v2015_v38 = vld [vmem:[#allocation3 + $0x188] ss:$16 sps:$4 sm:$0xff]   ;;  %v2023_v40 = vld [vmem:[#allocation3 + $0x16c] ss:$16 sps:$4 sm:$0xff]  }
  0xe9   :  { %v253_v49 = vpop.f32.mrf.mxu1  ;;  %v260_v50 = vpack.c.bf16 %v256_v45, %v256_v45  ;;  %v2018_v39 = vld [vmem:[#allocation3 + $0x388] ss:$16 sps:$4 sm:$0xff]   ;;  %v2026_v41 = vld [vmem:[#allocation3 + $0x36c] ss:$16 sps:$4 sm:$0xff]  }
  0xea   :  { %v262_v51 = vpack.c.bf16 %v258_v46, %v258_v46  ;;  %v2021_v42 = vld [vmem:[#allocation3 + $0x168] ss:$16 sps:$4 sm:$0xff]   ;;  %v2029_v44 = vld [vmem:[#allocation3 + $0x14c] ss:$16 sps:$4 sm:$0xff]  }
  0xeb   :  { %1085 = vmatprep.mubr.bf16.mxu0 %v260_v50  ;;  %v2024_v43 = vld [vmem:[#allocation3 + $0x368] ss:$16 sps:$4 sm:$0xff]   ;;  %v2032_v45 = vld [vmem:[#allocation3 + $0x34c] ss:$16 sps:$4 sm:$0xff]  }
  0xec   :  { %1126 = vmatprep.mubr.bf16.mxu1 %v262_v51  ;;  %1086 = vmatmul.mubr.bf16.vlgmr.msra.gmra.mxu0 %v2231_v54  ;;  %v2027_v46 = vld [vmem:[#allocation3 + $0x148] ss:$16 sps:$4 sm:$0xff]   ;;  %v2035_v49 = vld [vmem:[#allocation3 + $0x12c] ss:$16 sps:$4 sm:$0xff]  }
  0xed   :  { %1127 = vmatmul.mubr.bf16.vlgmr.msra.gmra.mxu1 %v2229_v47  ;;  %1136 = vmatpush1.bf16.msra.mxu0 %v1949_v52  ;;  %v2030_v48 = vld [vmem:[#allocation3 + $0x348] ss:$16 sps:$4 sm:$0xff]  }
  0xee   :  { %1177 = vmatpush1.bf16.msra.mxu1 %v1952_v53  ;;  %1167 = vmatprep.mubr.bf16.mxu0 %v260_v50  ;;  %v2038_v50 = vld [vmem:[#allocation3 + $0x32c] ss:$16 sps:$4 sm:$0xff]   ;;  %v2036_v52 = vld [vmem:[#allocation3 + $0x328] ss:$16 sps:$4 sm:$0xff]  }
  0xef   :  { %1208 = vmatprep.mubr.bf16.mxu1 %v262_v51  ;;  %1137 = vmatprep.subr.bf16.mxu0 %v1957_v55  ;;  %v2033_v51 = vld [vmem:[#allocation3 + $0x128] ss:$16 sps:$4 sm:$0xff]   ;;  %v2041_v53 = vld [vmem:[#allocation3 + $0x10c] ss:$16 sps:$4 sm:$0xff]  }
  0xf0   :  { %1178 = vmatprep.subr.bf16.mxu1 %v1960_v56  ;;  %v2044_v55 = vld [vmem:[#allocation3 + $0x30c] ss:$16 sps:$4 sm:$0xff]   ;;  %v2039_v56 = vld [vmem:[#allocation3 + $0x108] ss:$16 sps:$4 sm:$0xff]  }
  0xf1   :  { %1138 = vmatpush1.bf16.msra.mxu0 %v1955_v57  ;;  %v2042_v57 = vld [vmem:[#allocation3 + $0x308] ss:$16 sps:$4 sm:$0xff]  }
  0xf2   :  { %1179 = vmatpush1.bf16.msra.mxu1 %v1958_v58  ;;  %1139 = vmatprep.subr.bf16.mxu0 %v1963_v59  ;;  %v2045_v58 = vld [vmem:[%s2359_s5 + $0x78] sm:$0xff]  }
  0xf3   :  { %1180 = vmatprep.subr.bf16.mxu1 %v1966_v60  ;;  %v2046_v59 = vld [vmem:[%s2359_s5 + $0x38] sm:$0xff]   ;;  %v2047_v60 = vld [vmem:[%s2359_s5 + $0x70] sm:$0xff]  }
  0xf5   :  { %1140 = vmatpush1.bf16.msra.mxu0 %v1961_v61  ;;  %v2048_v61 = vld [vmem:[%s2359_s5 + $0x30] sm:$0xff]  }
  0xf6   :  { %1181 = vmatpush1.bf16.msra.mxu1 %v1964_v62  ;;  %1141 = vmatprep.subr.bf16.mxu0 %v1969_v63  ;;  %v2049_v62 = vld [vmem:[%s2359_s5 + $0x68] sm:$0xff]  }
  0xf7   :  { %1182 = vmatprep.subr.bf16.mxu1 %v1972_v0  ;;  %v2050_v63 = vld [vmem:[%s2359_s5 + $0x28] sm:$0xff]   ;;  %v2053_v0 = vld [vmem:[%s2359_s5 + $0x58] sm:$0xff]  }
  0xf9   :  { %1142 = vmatpush1.bf16.msra.mxu0 %v1967_v1  ;;  %v2061_v1 = vld [vmem:[%s2359_s5 + $0xf8] sm:$0xff]  }
  0xfa   :  { %1183 = vmatpush1.bf16.msra.mxu1 %v1970_v2  ;;  %1143 = vmatprep.subr.bf16.mxu0 %v1975_v3  ;;  %v2062_v2 = vld [vmem:[%s2359_s5 + $0xb8] sm:$0xff]   ;;  %v2063_v3 = vld [vmem:[%s2359_s5 + $0xf0] sm:$0xff]  }
  0xfb   :  { %1184 = vmatprep.subr.bf16.mxu1 %v1978_v4  ;;  %v2054_v4 = vld [vmem:[%s2359_s5 + $0x18] sm:$0xff]  }
  0xfd   :  { %1144 = vmatpush1.bf16.msra.mxu0 %v1973_v5  ;;  %v2055_v5 = vld [vmem:[%s2359_s5 + $0x50] sm:$0xff]  }
  0xfe   :  { %1185 = vmatpush1.bf16.msra.mxu1 %v1976_v6  ;;  %1145 = vmatprep.subr.bf16.mxu0 %v1981_v7  ;;  %v2064_v6 = vld [vmem:[%s2359_s5 + $0xb0] sm:$0xff]   ;;  %v2065_v7 = vld [vmem:[%s2359_s5 + $0xe8] sm:$0xff]  }
  0xff   :  { %1186 = vmatprep.subr.bf16.mxu1 %v1984_v8  ;;  %v2056_v8 = vld [vmem:[%s2359_s5 + $0x10] sm:$0xff]  }
 0x101   :  { %1146 = vmatpush1.bf16.msra.mxu0 %v1979_v9  ;;  %v2057_v9 = vld [vmem:[%s2359_s5 + $0x48] sm:$0xff]  }
 0x102   :  { %1187 = vmatpush1.bf16.msra.mxu1 %v1982_v10  ;;  %1147 = vmatprep.subr.bf16.mxu0 %v1987_v11  ;;  %v2066_v10 = vld [vmem:[%s2359_s5 + $0xa8] sm:$0xff]   ;;  %v2067_v11 = vld [vmem:[%s2359_s5 + $0xe0] sm:$0xff]  }
 0x103   :  { %1188 = vmatprep.subr.bf16.mxu1 %v1990_v12  ;;  %v2058_v12 = vld [vmem:[%s2359_s5 + $0x8] sm:$0xff]  }
 0x105   :  { %1148 = vmatpush1.bf16.msra.mxu0 %v1985_v13  ;;  %v2059_v13 = vld [vmem:[%s2359_s5 + $0x40] sm:$0xff]  }
 0x106   :  { %1189 = vmatpush1.bf16.msra.mxu1 %v1988_v14  ;;  %1149 = vmatprep.subr.bf16.mxu0 %v1993_v15  ;;  %v2068_v14 = vld [vmem:[%s2359_s5 + $0xa0] sm:$0xff]   ;;  %v2069_v15 = vld [vmem:[%s2359_s5 + $0xd8] sm:$0xff]  }
 0x107   :  { %1190 = vmatprep.subr.bf16.mxu1 %v1996_v16  ;;  %v2060_v16 = vld [vmem:[%s2359_s5] sm:$0xff]  }
 0x109   :  { %1150 = vmatpush1.bf16.msra.mxu0 %v1991_v17  ;;  %v2070_v17 = vld [vmem:[%s2359_s5 + $0x98] sm:$0xff]  }
 0x10a   :  { %1191 = vmatpush1.bf16.msra.mxu1 %v1994_v18  ;;  %1151 = vmatprep.subr.bf16.mxu0 %v1999_v19  ;;  %v2071_v18 = vld [vmem:[%s2359_s5 + $0xd0] sm:$0xff]  }
 0x10b   :  { %1192 = vmatprep.subr.bf16.mxu1 %v2002_v20  ;;  %v2072_v19 = vld [vmem:[%s2359_s5 + $0x90] sm:$0xff]   ;;  %v2073_v20 = vld [vmem:[%s2359_s5 + $0xc8] sm:$0xff]  }
 0x10d   :  { %1152 = vmatpush2.bf16.msra.mxu0 %v1997_v21  ;;  %v2074_v21 = vld [vmem:[%s2359_s5 + $0x88] sm:$0xff]  }
 0x10e   :  { %1193 = vmatpush2.bf16.msra.mxu1 %v2000_v22  ;;  %1153 = vmatprep.subr.bf16.mxu0 %v2005_v26  ;;  %v2075_v22 = vld [vmem:[%s2359_s5 + $0xc0] sm:$0xff]  }
 0x10f   :  { %1194 = vmatprep.subr.bf16.mxu1 %v2008_v29  ;;  %v2076_v26 = vld [vmem:[%s2359_s5 + $0x80] sm:$0xff]  }
 0x110   :  { %v391_v29 = vld [vmem:[%s2358_s4] sm:$0xf] }
 0x111   :  { %1154 = vmatpush2.bf16.msra.mxu0 %v2003_v30  ;;  %v396_v30 = vrot.slane %v391_v29, %v71_v24  ;;  %v404_v24 = vrot.slane %v391_v29, %v79_v25 }
 0x112   :  { %1195 = vmatpush2.bf16.msra.mxu1 %v2006_v31  ;;  %1155 = vmatprep.subr.bf16.mxu0 %v2011_v32  ;;  %v400_v31 = vrot.slane %v391_v29, %v75_v27  ;;  %v408_v27 = vrot.slane %v391_v29, %v83_v28 }
 0x113   :  { %1196 = vmatprep.subr.bf16.mxu1 %v2014_v33 }
 0x115   :  { %1156 = vmatpush2.bf16.msra.mxu0 %v2009_v34 }
 0x116   :  { %1197 = vmatpush2.bf16.msra.mxu1 %v2012_v35  ;;  %1157 = vmatprep.subr.bf16.mxu0 %v2017_v36 }
 0x117   :  { %1198 = vmatprep.subr.bf16.mxu1 %v2020_v37 }
 0x119   :  { %1158 = vmatpush2.bf16.msra.mxu0 %v2015_v38 }
 0x11a   :  { %1199 = vmatpush2.bf16.msra.mxu1 %v2018_v39  ;;  %1159 = vmatprep.subr.bf16.mxu0 %v2023_v40 }
 0x11b   :  { %1200 = vmatprep.subr.bf16.mxu1 %v2026_v41 }
 0x11d   :  { %1160 = vmatpush2.bf16.msra.mxu0 %v2021_v42 }
 0x11e   :  { %1201 = vmatpush2.bf16.msra.mxu1 %v2024_v43  ;;  %1161 = vmatprep.subr.bf16.mxu0 %v2029_v44 }
 0x11f   :  { %1202 = vmatprep.subr.bf16.mxu1 %v2032_v45 }
 0x121   :  { %1162 = vmatpush2.bf16.msra.mxu0 %v2027_v46 }
 0x122   :  { %1203 = vmatpush2.bf16.msra.mxu1 %v2030_v48  ;;  %1163 = vmatprep.subr.bf16.mxu0 %v2035_v49 }
 0x123   :  { %1204 = vmatprep.subr.bf16.mxu1 %v2038_v50 }
 0x125   :  { %1164 = vmatpush2.bf16.msra.mxu0 %v2033_v51 }
 0x126   :  { %1205 = vmatpush2.bf16.msra.mxu1 %v2036_v52  ;;  %1165 = vmatprep.subr.bf16.mxu0 %v2041_v53 }
 0x127   :  { %1206 = vmatprep.subr.bf16.mxu1 %v2044_v55 }
 0x129   :  { %1166 = vmatpush2.bf16.msra.mxu0 %v2039_v56 }
 0x12a   :  { %1207 = vmatpush2.bf16.msra.mxu1 %v2042_v57  ;;  %1780 = vmatprep.subr.bf16.mxu0 %v2045_v58 }
 0x12b   :  { %1802 = vmatprep.subr.bf16.mxu1 %v2061_v1 }
 0x12c   :  { %1168 = vmatmul.mubr.bf16.vlgmr.msra.gmra.mxu0 %v2231_v54  ;;  %v2052_v54 = vld [vmem:[%s2359_s5 + $0x20] sm:$0xff]  }
 0x12d   :  { %1209 = vmatmul.mubr.bf16.vlgmr.msra.gmra.mxu1 %v2229_v47  ;;  %1781 = vmatpush3.bf16.msra.mxu0 %v2046_v59  ;;  %v2051_v47 = vld [vmem:[%s2359_s5 + $0x60] sm:$0xff]  }
 0x12e   :  { %1782 = vmatprep.subr.bf16.mxu0 %v2047_v60  ;;  %1803 = vmatpush3.bf16.msra.mxu1 %v2062_v2  ;;  %v1745_v2 = vld [vmem:[%s2360_s6] ss:$0 sm:$0xff] }
 0x12f   :  { %1804 = vmatprep.subr.bf16.mxu1 %v2063_v3 }
 0x131   :  { %1783 = vmatpush3.bf16.msra.mxu0 %v2048_v61 }
 0x132   :  { %1784 = vmatprep.subr.bf16.mxu0 %v2049_v62  ;;  %1805 = vmatpush3.bf16.msra.mxu1 %v2064_v6 }
 0x133   :  { %1806 = vmatprep.subr.bf16.mxu1 %v2065_v7 }
 0x135   :  { %1785 = vmatpush3.bf16.msra.mxu0 %v2050_v63 }
 0x136   :  { %1786 = vmatprep.subr.bf16.mxu0 %v2051_v47  ;;  %1807 = vmatpush3.bf16.msra.mxu1 %v2066_v10  ;;  %v1778_v10 = vld [vmem:[%s2361_s7] ss:$0 sm:$0xff] }
 0x137   :  { %1808 = vmatprep.subr.bf16.mxu1 %v2067_v11 }
 0x139   :  { %1787 = vmatpush3.bf16.msra.mxu0 %v2052_v54 }
 0x13a   :  { %1788 = vmatprep.subr.bf16.mxu0 %v2053_v0  ;;  %1809 = vmatpush3.bf16.msra.mxu1 %v2068_v14  ;;  %v1779_v14 = vld [vmem:[#allocation2] ss:$0 sm:$0xff] }
 0x13b   :  { %1810 = vmatprep.subr.bf16.mxu1 %v2069_v15 }
 0x13d   :  { %1789 = vmatpush3.bf16.msra.mxu0 %v2054_v4 }
 0x13e   :  { %1790 = vmatprep.subr.bf16.mxu0 %v2055_v5  ;;  %1811 = vmatpush3.bf16.msra.mxu1 %v2070_v17 }
 0x13f   :  { %1812 = vmatprep.subr.bf16.mxu1 %v2071_v18 }
 0x141   :  { %1791 = vmatpush3.bf16.msra.mxu0 %v2056_v8 }
 0x142   :  { %1792 = vmatprep.subr.bf16.mxu0 %v2057_v9  ;;  %1813 = vmatpush3.bf16.msra.mxu1 %v2072_v19 }
 0x143   :  { %1814 = vmatprep.subr.bf16.mxu1 %v2073_v20 }
 0x145   :  { %1793 = vmatpush3.bf16.msra.mxu0 %v2058_v12 }
 0x146   :  { %1794 = vmatprep.subr.bf16.mxu0 %v2059_v13  ;;  %1815 = vmatpush3.bf16.msra.mxu1 %v2074_v21 }
 0x147   :  { %1816 = vmatprep.subr.bf16.mxu1 %v2075_v22 }
 0x149   :  { %1795 = vmatpush3.bf16.msra.mxu0 %v2060_v16 }
 0x14a   :  { %1817 = vmatpush3.bf16.msra.mxu1 %v2076_v26 }
 0x1ac   :  { %v1087_v32 = vpop.f32.mrf.mxu0 }
 0x1ad   :  { %v1128_v33 = vpop.f32.mrf.mxu1  ;;  %v1088_v34 = vadd.f32 %v1087_v32, %v396_v30 }
 0x1ae   :  { %v1089_v35 = vpop.f32.mrf.mxu0 }
 0x1af   :  { %v1130_v36 = vpop.f32.mrf.mxu1  ;;  %v1129_v37 = vadd.f32 %v1128_v33, %v1088_v34  ;;  %v1090_v38 = vadd.f32 %v1089_v35, %v400_v31 }
 0x1b0   :  { %v1091_v39 = vpop.f32.mrf.mxu0 }
 0x1b1   :  { %v1132_v40 = vpop.f32.mrf.mxu1  ;;  %v1131_v41 = vadd.f32 %v1130_v36, %v1090_v38  ;;  %v1217_v42 = vmax.f32 %v1129_v37, 0.0 }
 0x1b2   :  { %v1092_v43 = vpop.f32.mrf.mxu0 }
 0x1b3   :  { %v1133_v44 = vpop.f32.mrf.mxu1  ;;  %v1218_v45 = vmax.f32 %v1131_v41, 0.0  ;;  %v1221_v48 = vpack.c.bf16 %v1217_v42, %v1217_v42 }
 0x1b5   :  { %v1222_v46 = vpack.c.bf16 %v1218_v45, %v1218_v45 }
 0x1b7   :  { %1520 = vmatprep.mubr.bf16.mxu0 %v1222_v46 }
 0x1b8   :  { %1521 = vmatmul.mubr.bf16.vlgmr.msra.gmra.mxu0 %v1221_v48 }
 0x1ec   :  { %v1169_v49 = vpop.f32.mrf.mxu0 }
 0x1ed   :  { %v1210_v50 = vpop.f32.mrf.mxu1  ;;  %v1170_v51 = vadd.f32 %v1169_v49, %v404_v24 }
 0x1ee   :  { %v1171_v52 = vpop.f32.mrf.mxu0 }
 0x1ef   :  { %v1212_v53 = vpop.f32.mrf.mxu1  ;;  %v1211_v55 = vadd.f32 %v1210_v50, %v1170_v51  ;;  %v1172_v56 = vadd.f32 %v1171_v52, %v408_v27 }
 0x1f0   :  { %v1173_v57 = vpop.f32.mrf.mxu0 }
 0x1f1   :  { %v1214_v58 = vpop.f32.mrf.mxu1  ;;  %v1213_v59 = vadd.f32 %v1212_v53, %v1172_v56  ;;  %v1219_v60 = vmax.f32 %v1211_v55, 0.0 }
 0x1f2   :  { %v1174_v61 = vpop.f32.mrf.mxu0 }
 0x1f3   :  { %v1215_v62 = vpop.f32.mrf.mxu1  ;;  %v1220_v63 = vmax.f32 %v1213_v59, 0.0  ;;  %v1223_v54 = vpack.c.bf16 %v1219_v60, %v1219_v60 }
 0x1f5   :  { %v1224_v47 = vpack.c.bf16 %v1220_v63, %v1220_v63 }
 0x1f7   :  { %1560 = vmatprep.mubr.bf16.mxu1 %v1224_v47 }
 0x1f8   :  { %1561 = vmatmul.mubr.bf16.vlgmr.msra.gmra.mxu1 %v1223_v54 }
 0x278   :  { %v1796_v23 = vpop.f32.mrf.mxu0 }
 0x27a   :  { %v1797_v25 = vpop.f32.mrf.mxu0 }
 0x27b   :  { %v1798_v1 = vadd.f32 %v1797_v25, %v1796_v23 }
 0x27c   :  { %v1799_v28 = vpop.f32.mrf.mxu0 }
 0x27d   :  { %v1523_v5 = vadd.f32 %v1798_v1, %v1745_v2 }
 0x27e   :  { %v1800_v0 = vpop.f32.mrf.mxu0 }
 0x2b8   :  { %v1818_v3 = vpop.f32.mrf.mxu1 }
 0x2ba   :  { %v1819_v4 = vpop.f32.mrf.mxu1 }
 0x2bb   :  { %v1820_v6 = vadd.f32 %v1819_v4, %v1818_v3 }
 0x2bc   :  { %v1821_v7 = vpop.f32.mrf.mxu1 }
 0x2bd   :  { %v1563_v8 = vadd.f32 %v1820_v6, %v1523_v5 }
 0x2be   :  { %v1822_v9 = vpop.f32.mrf.mxu1 }
 0x2bf   :  { %v1568_v11 = vmax.f32 %v1563_v8, 0.0 }
 0x2c1   :  { %v1576_v12 = vmul.f32 %v1778_v10, %v1568_v11 }
 0x2c3   :  { %v1577_v13 = vsel %vm169_vm0, %v1576_v12, 0.0 }
 0x2c4   :  { %1578 = vadd.xlane.f32.xlu0 %v1577_v13 }
 0x34d   :  { %v1579_v15 = vpop.xlane.xlu0 %1578 }
 0x34e   :  { %v1587_v16 = vadd.f32 %v1779_v14, %v1579_v15 }
 0x350   :  { %1590 = vperm.xlu0 %1828, %v1587_v16  }
 0x3cb   :  { %v1591_v17 = vpop.permute.xlu0 %1590 }
 0x3cc   :  { %1593 = vst [vmem:[%s2363_s9] sm:$0xff] %v1591_v17 }
 0x3cd   :  { %1598 = vsyncpa [#allocation4], 1 }

</bundles_post_ra>
